<compile_context>
chip_gen: v5e
topology: v5e:2x2
jax: 0.10.0
libtpu: 0.0.40
codegen_flags: <defaults>
</compile_context>

<pallas_src>
import functools
import math

import jax
import jax.numpy as jnp
from jax.experimental import pallas as pl
from jax.experimental.pallas import tpu as pltpu


def _round_up(x, m):
    return -(-x // m) * m


def _patch_merging_kernel(x_ref, w_ref, bias_ref, o_ref, *, eps, mxu_dtype):
    """Fused 2x2 gather + LayerNorm + reduction matmul.

    x_ref:    (tb, 2, W/2, 2C)   hr=0 rows hold [x0|x2], hr=1 rows hold [x1|x3]
    w_ref:    (2, 2C, O)         gamma-folded reduction weight, kernel order
    bias_ref: (1, O)             beta @ w   (f32)
    o_ref:    (tb * W/2, O)
    """
    tb, _, wh, c2 = x_ref.shape
    rows = tb * wh
    inv_k4 = 1.0 / (2 * c2)

    # hr slices are whole (W/2, 2C) tiles -> clean vector loads; the leading
    # dim collapse is layout-preserving whenever W/2 is sublane aligned.
    xa = x_ref[:, 0].reshape(rows, c2).astype(jnp.float32)
    xb = x_ref[:, 1].reshape(rows, c2).astype(jnp.float32)

    # LayerNorm statistics over the (virtual) 4C feature dim, f32 math.
    mean = (jnp.sum(xa, axis=-1, keepdims=True)
            + jnp.sum(xb, axis=-1, keepdims=True)) * inv_k4
    xa_c = xa - mean
    xb_c = xb - mean
    var = (jnp.sum(xa_c * xa_c, axis=-1, keepdims=True)
           + jnp.sum(xb_c * xb_c, axis=-1, keepdims=True)) * inv_k4
    inv = jax.lax.rsqrt(var + eps)

    # gamma folded into w, beta folded into bias -> only normalize here.
    na = (xa_c * inv).astype(mxu_dtype)
    nb = (xb_c * inv).astype(mxu_dtype)

    y = jnp.dot(na, w_ref[0], preferred_element_type=jnp.float32)
    y = y + jnp.dot(nb, w_ref[1], preferred_element_type=jnp.float32)
    y = y + bias_ref[...]
    o_ref[...] = y.astype(o_ref.dtype)


def _choose_row_tile(R, Wh, granule, tb_cap):
    """Pick tb (tile over the B*H/2 axis): aligned, VMEM-capped, >=2 grid steps."""
    tb = max(1, min(tb_cap, R))
    if tb < R:
        # Partial blocks must keep the output tile sublane-aligned.
        tb = (tb // granule) * granule
        if tb == 0:
            tb = R if granule >= R else granule
    # Keep >= 2 grid steps when possible so v7x's 2 TensorCores both get work
    # (also enables DMA/compute overlap); harmless on single-TC v5e/v6e.
    if tb == R and R >= 2 * granule:
        half = _round_up(_round_up(R, 2) // 2, granule)
        if half < R:
            tb = half
    return tb


def patch_merging_forward(x, H, W, gamma, beta, w, *, eps=1e-5,
                          mxu_dtype=jnp.bfloat16):
    """PatchMerging forward.

    x:     (B, H*W, C)
    gamma: (4C,)  LayerNorm weight      beta: (4C,)  LayerNorm bias
    w:     (4C, 2C) reduction weight (transposed vs torch's (out, in) layout)
    mxu_dtype: dtype of the matmul operands (bf16 default; stats stay f32).
    """
    B, L, C = x.shape
    assert L == H * W, "input feature has wrong size"
    # The torch module also asserts even H/W (its pad branch is dead code).
    assert H % 2 == 0 and W % 2 == 0, "H and W must be even"
    K4 = 4 * C
    O = w.shape[1]
    assert w.shape == (K4, O) and gamma.shape == (K4,) and beta.shape == (K4,)

    R, Wh, C2 = B * (H // 2), W // 2, 2 * C
    M = R * Wh

    # Free, layout-preserving view: (B, H*W, C) -> (B*H/2, hr, W/2, 2C).
    # For fixed hr the 2C slots are ordered (wr, c): hr=0 -> [x0|x2], hr=1 -> [x1|x3].
    x4 = x.reshape(R, 2, Wh, C2)

    # Fold the LayerNorm affine into the reduction:
    #   y = ((xm - mu) * rsqrt(var + eps)) @ (gamma[:, None] * w) + beta @ w
    # and permute the weight's 4C rows from torch order (wr, hr, c) to the
    # kernel's (hr, wr, c) order (one-time work on parameters only).
    gamma_f = gamma.astype(jnp.float32)
    beta_f = beta.astype(jnp.float32)
    w_f = w.astype(jnp.float32)
    bias = (beta_f @ w_f).reshape(1, O)                            # (1, O) f32
    w_k = (gamma_f[:, None] * w_f).reshape(2, 2, C, O)             # (wr, hr, c, O)
    w_k = w_k.transpose(1, 0, 2, 3).reshape(2, C2, O).astype(mxu_dtype)

    # ---- per-generation tile sizing (v7x: 64 MiB VMEM, v5e/v6e: 128 MiB) ----
    x_bytes = jnp.dtype(x.dtype).itemsize
    out_bytes = x_bytes
    w_bytes = jnp.dtype(mxu_dtype).itemsize
    try:
        vmem_cap = int(pltpu.get_tpu_info().vmem_capacity_bytes)
    except Exception:
        vmem_cap = 64 * 1024 * 1024          # v7x-safe fallback
    tile_budget = int(vmem_cap * 0.55)       # what our buffers may occupy
    vmem_limit = int(vmem_cap * 0.75)        # scoped limit, headroom for scratch

    # Bytes per unit of tb (= per W/2 merged tokens).
    per_tb = (2 * (2 * Wh * C2 * x_bytes)                       # input, 2x buffered
              + 2 * (Wh * O * out_bytes)                        # output, 2x buffered
              + Wh * (4 * C2 * 4 + 2 * C2 * w_bytes + 4 * O))   # in-kernel temporaries
    fixed = 2 * C2 * O * w_bytes + 4 * O                        # resident weight + bias
    tb_vmem = max((tile_budget - fixed) // per_tb, 1)

    sub_out = max(8, 32 // out_bytes)                 # dtype-aware sublane packing
    granule = sub_out // math.gcd(Wh, sub_out)        # tb granule for aligned stores
    target_rows = max(4096 // x_bytes, sub_out)       # ~1k-row sweet spot for f32
    tb_cap = min(tb_vmem, max(target_rows // Wh, 1))
    tb = _choose_row_tile(R, Wh, granule, tb_cap)
    rows_t = tb * Wh
    grid = (pl.cdiv(R, tb),)

    def _const_spec(shape):
        # Grid-invariant operand: VMEM resident, single-buffered.
        nd = len(shape)
        return pl.BlockSpec(shape, lambda i: (0,) * nd, pipeline_mode=pl.Buffered(1))

    out = pl.pallas_call(
        functools.partial(_patch_merging_kernel, eps=eps, mxu_dtype=mxu_dtype),
        out_shape=jax.ShapeDtypeStruct((M, O), x.dtype),
        grid=grid,
        in_specs=[
            pl.BlockSpec((tb, 2, Wh, C2), lambda i: (i, 0, 0, 0)),  # activations
            _const_spec((2, C2, O)),                                # folded weight
            _const_spec((1, O)),                                    # folded bias
        ],
        out_specs=pl.BlockSpec((rows_t, O), lambda i: (i, 0)),
        compiler_params=pltpu.CompilerParams(
            dimension_semantics=("parallel",),
            vmem_limit_bytes=vmem_limit,
        ),
    )(x4, w_k, bias)

    return out.reshape(B, (H // 2) * Wh, O)


def _reference_patch_merging(x, H, W, gamma, beta, w, eps=1e-5):
    B, L, C = x.shape
    xr = x.reshape(B, H, W, C)
    x0 = xr[:, 0::2, 0::2, :]
    x1 = xr[:, 1::2, 0::2, :]
    x2 = xr[:, 0::2, 1::2, :]
    x3 = xr[:, 1::2, 1::2, :]
    xm = jnp.concatenate([x0, x1, x2, x3], axis=-1).reshape(B, -1, 4 * C)
    mean = xm.mean(-1, keepdims=True)
    var = ((xm - mean) ** 2).mean(-1, keepdims=True)
    xn = (xm - mean) * jax.lax.rsqrt(var + eps) * gamma + beta
    return jnp.dot(xn, w)


if __name__ == "__main__":
    # Small shapes consistent with the module: x is (B, H*W, dim), H/W even.
    B, dim, H, W = 2, 16, 16, 16

    key = jax.random.PRNGKey(0)
    kx, kg, kb, kw = jax.random.split(key, 4)

    x = jax.random.normal(kx, (B, H * W, dim), dtype=jnp.float32)
    gamma = jax.random.uniform(kg, (4 * dim,), minval=0.5, maxval=1.5, dtype=jnp.float32)
    beta = jax.random.uniform(kb, (4 * dim,), minval=-0.5, maxval=0.5, dtype=jnp.float32)
    lim = 1.0 / math.sqrt(4 * dim)
    # Stored transposed relative to torch's (out_features, in_features) layout.
    w = jax.random.uniform(kw, (4 * dim, 2 * dim), minval=-lim, maxval=lim,
                           dtype=jnp.float32)

    y_ref = _reference_patch_merging(x, H, W, gamma, beta, w)

    # Exact-path check (f32 MXU operands).
    y32 = jax.block_until_ready(
        patch_merging_forward(x, H, W, gamma, beta, w, mxu_dtype=jnp.float32))
    assert y32.shape == (B, (H // 2) * (W // 2), 2 * dim)
    assert jnp.allclose(y32, y_ref, atol=1e-3, rtol=1e-3), "f32 path mismatch"

    # Default fast path: bf16 MXU operands, f32 LayerNorm statistics.
    ybf = jax.block_until_ready(patch_merging_forward(x, H, W, gamma, beta, w))
    assert ybf.shape == y_ref.shape
    assert jnp.allclose(ybf, y_ref, atol=5e-2, rtol=5e-2), "bf16 path mismatch"

    print("KERNEL_OK")
</pallas_src>

<mosaic_0001>
module attributes {stable_mosaic.version = 11 : i64} {
  func.func @_patch_merging_kernel(%arg0: i32, %arg1: memref<8x2x8x32xf32, #tpu.memory_space<vmem>>, %arg2: memref<2x32x32xf32, #tpu.memory_space<vmem>>, %arg3: memref<1x32xf32, #tpu.memory_space<vmem>>, %arg4: memref<64x32xf32, #tpu.memory_space<vmem>>) attributes {dimension_semantics = [#tpu.dimension_semantics<parallel>], iteration_bounds = array<i64: 2>, scalar_prefetch = 0 : i64, scratch_operands = 0 : i64, tpu.core_type = #tpu.core_type<tc>, window_params = [{transform_indices = @transform_0, window_bounds = array<i64: 8, 2, 8, 32>}, {pipeline_mode = #tpu.pipeline_mode<synchronous>, transform_indices = @transform_1, window_bounds = array<i64: 2, 32, 32>}, {pipeline_mode = #tpu.pipeline_mode<synchronous>, transform_indices = @transform_2, window_bounds = array<i64: 1, 32>}, {transform_indices = @transform_3, window_bounds = array<i64: 64, 32>}]} {
    %c0 = arith.constant 0 : index
    %c0_0 = arith.constant 0 : index
    %c0_1 = arith.constant 0 : index
    %c0_2 = arith.constant 0 : index
    %0 = vector.load %arg1[%c0, %c0_0, %c0_1, %c0_2] : memref<8x2x8x32xf32, #tpu.memory_space<vmem>>, vector<8x1x8x32xf32>
    %1 = vector.shape_cast %0 : vector<8x1x8x32xf32> to vector<8x8x32xf32>
    %2 = vector.shape_cast %1 : vector<8x8x32xf32> to vector<64x32xf32>
    %c0_3 = arith.constant 0 : index
    %c1 = arith.constant 1 : index
    %c0_4 = arith.constant 0 : index
    %c0_5 = arith.constant 0 : index
    %3 = vector.load %arg1[%c0_3, %c1, %c0_4, %c0_5] : memref<8x2x8x32xf32, #tpu.memory_space<vmem>>, vector<8x1x8x32xf32>
    %4 = vector.shape_cast %3 : vector<8x1x8x32xf32> to vector<8x8x32xf32>
    %5 = vector.shape_cast %4 : vector<8x8x32xf32> to vector<64x32xf32>
    %cst = arith.constant dense<0.000000e+00> : vector<64xf32>
    %6 = vector.multi_reduction <add>, %2, %cst [1] : vector<64x32xf32> to vector<64xf32>
    %7 = vector.shape_cast %6 : vector<64xf32> to vector<64x1xf32>
    %cst_6 = arith.constant dense<0.000000e+00> : vector<64xf32>
    %8 = vector.multi_reduction <add>, %5, %cst_6 [1] : vector<64x32xf32> to vector<64xf32>
    %9 = vector.shape_cast %8 : vector<64xf32> to vector<64x1xf32>
    %10 = arith.addf %7, %9 : vector<64x1xf32>
    %cst_7 = arith.constant 1.562500e-02 : f32
    %11 = vector.broadcast %cst_7 : f32 to vector<64x1xf32>
    %12 = arith.mulf %10, %11 : vector<64x1xf32>
    %13 = vector.broadcast %12 : vector<64x1xf32> to vector<64x32xf32>
    %14 = arith.subf %2, %13 : vector<64x32xf32>
    %15 = vector.broadcast %12 : vector<64x1xf32> to vector<64x32xf32>
    %16 = arith.subf %5, %15 : vector<64x32xf32>
    %17 = arith.mulf %14, %14 : vector<64x32xf32>
    %cst_8 = arith.constant dense<0.000000e+00> : vector<64xf32>
    %18 = vector.multi_reduction <add>, %17, %cst_8 [1] : vector<64x32xf32> to vector<64xf32>
    %19 = vector.shape_cast %18 : vector<64xf32> to vector<64x1xf32>
    %20 = arith.mulf %16, %16 : vector<64x32xf32>
    %cst_9 = arith.constant dense<0.000000e+00> : vector<64xf32>
    %21 = vector.multi_reduction <add>, %20, %cst_9 [1] : vector<64x32xf32> to vector<64xf32>
    %22 = vector.shape_cast %21 : vector<64xf32> to vector<64x1xf32>
    %23 = arith.addf %19, %22 : vector<64x1xf32>
    %cst_10 = arith.constant 1.562500e-02 : f32
    %24 = vector.broadcast %cst_10 : f32 to vector<64x1xf32>
    %25 = arith.mulf %23, %24 : vector<64x1xf32>
    %cst_11 = arith.constant 9.99999974E-6 : f32
    %26 = vector.broadcast %cst_11 : f32 to vector<64x1xf32>
    %27 = arith.addf %25, %26 : vector<64x1xf32>
    %28 = math.rsqrt %27 : vector<64x1xf32>
    %29 = vector.broadcast %28 : vector<64x1xf32> to vector<64x32xf32>
    %30 = arith.mulf %14, %29 : vector<64x32xf32>
    %31 = vector.broadcast %28 : vector<64x1xf32> to vector<64x32xf32>
    %32 = arith.mulf %16, %31 : vector<64x32xf32>
    %c0_12 = arith.constant 0 : index
    %c0_13 = arith.constant 0 : index
    %c0_14 = arith.constant 0 : index
    %33 = vector.load %arg2[%c0_12, %c0_13, %c0_14] : memref<2x32x32xf32, #tpu.memory_space<vmem>>, vector<1x32x32xf32>
    %34 = vector.shape_cast %33 : vector<1x32x32xf32> to vector<32x32xf32>
    %cst_15 = arith.constant dense<0.000000e+00> : vector<64x32xf32>
    %35 = tpu.matmul %30, %34, %cst_15 {dimension_numbers = #tpu.dot_dimension_numbers<[1], [0], [0], [1], [0, 0, 1, 1], [], []>} : vector<64x32xf32>, vector<32x32xf32>, vector<64x32xf32> -> vector<64x32xf32>
    %c1_16 = arith.constant 1 : index
    %c0_17 = arith.constant 0 : index
    %c0_18 = arith.constant 0 : index
    %36 = vector.load %arg2[%c1_16, %c0_17, %c0_18] : memref<2x32x32xf32, #tpu.memory_space<vmem>>, vector<1x32x32xf32>
    %37 = vector.shape_cast %36 : vector<1x32x32xf32> to vector<32x32xf32>
    %cst_19 = arith.constant dense<0.000000e+00> : vector<64x32xf32>
    %38 = tpu.matmul %32, %37, %cst_19 {dimension_numbers = #tpu.dot_dimension_numbers<[1], [0], [0], [1], [0, 0, 1, 1], [], []>} : vector<64x32xf32>, vector<32x32xf32>, vector<64x32xf32> -> vector<64x32xf32>
    %39 = arith.addf %35, %38 : vector<64x32xf32>
    %c0_20 = arith.constant 0 : index
    %c0_21 = arith.constant 0 : index
    %40 = vector.load %arg3[%c0_20, %c0_21] : memref<1x32xf32, #tpu.memory_space<vmem>>, vector<1x32xf32>
    %41 = vector.broadcast %40 : vector<1x32xf32> to vector<64x32xf32>
    %42 = arith.addf %39, %41 : vector<64x32xf32>
    %c0_22 = arith.constant 0 : index
    %c0_23 = arith.constant 0 : index
    %43 = vector.load %arg4[%c0_22, %c0_23] : memref<64x32xf32, #tpu.memory_space<vmem>>, vector<64x32xf32>
    tpu.vector_store %arg4[%c0_22, %c0_23], %42 {strides = array<i32>} : memref<64x32xf32, #tpu.memory_space<vmem>>, vector<64x32xf32>,
    return
  }
  func.func @transform_0(%arg0: i32) -> (i32, i32, i32, i32) {
    %c0_i32 = arith.constant 0 : i32
    %c0_i32_0 = arith.constant 0 : i32
    %c0_i32_1 = arith.constant 0 : i32
    %c0_i32_2 = arith.constant 0 : i32
    return %arg0, %c0_i32, %c0_i32_0, %c0_i32_1 : i32, i32, i32, i32
  }
  func.func @transform_1(%arg0: i32) -> (i32, i32, i32) {
    %c0_i32 = arith.constant 0 : i32
    %c0_i32_0 = arith.constant 0 : i32
    %c0_i32_1 = arith.constant 0 : i32
    %c0_i32_2 = arith.constant 0 : i32
    return %c0_i32, %c0_i32_0, %c0_i32_1 : i32, i32, i32
  }
  func.func @transform_2(%arg0: i32) -> (i32, i32) {
    %c0_i32 = arith.constant 0 : i32
    %c0_i32_0 = arith.constant 0 : i32
    %c0_i32_1 = arith.constant 0 : i32
    return %c0_i32, %c0_i32_0 : i32, i32
  }
  func.func @transform_3(%arg0: i32) -> (i32, i32) {
    %c0_i32 = arith.constant 0 : i32
    %c0_i32_0 = arith.constant 0 : i32
    return %arg0, %c0_i32 : i32, i32
  }
}

</mosaic_0001>

<bundles_post_ra>
// kernel: tpu_custom_call.1
= control target key start
LH: loop header
LB: loop body
LE: loop exit
PB: predicated region body
PF: predicated region fallthrough
CT: control target
= control target key end

     0   :  { %8 = vsyncpa [#allocation3], 0  ;;  %s1305_s0 = inlined_call_operand.hbm [shape: f32[16,2,8,32], index: 0, kind: input, shape index: {}]   ;;  %s1306_s1 = inlined_call_operand.hbm [shape: f32[2,32,32], index: 1, kind: input, shape index: {}]   ;;  %s1307_s2 = inlined_call_operand.vmem [shape: f32[1,32], index: 2, kind: input, shape index: {}]   ;;  %s1308_s3 = inlined_call_operand.vmem [shape: f32[128,32], index: 3, kind: output, shape index: {}]  }
   0x1   :  { %10 = vsyncpa [#allocation3 + $0x1], 0 }
   0x2   :  { %11 = vsyncpa [#allocation5], 0  ;;  %s973_s12 = smov 0   ;;  %s975_s13 = smov 0  }
   0x3   :  { %s977_s14 = smov 0   ;;  %s979_s15 = smov 0  }
   0x4 LB: > { %s731_s16 = sadd.s32 4294967295, %s948_s15   ;;  %p37_p0 = scmp.ne.s32.totalorder %s940_s13, %s936_s12  ;;  %s948_s15 = sphi %s979_s15, %s1316_s15   ;;  %s944_s14 = sphi %s977_s14, %s1315_s14   ;;  %s940_s13 = sphi %s975_s13, %s1314_s13   ;;  %s936_s12 = sphi %s973_s12, %s1313_s12  }
   0x5   : > { %p995_p1 = scmp.eq.s32.totalorder %s731_s16, 0  ;;  %p733_p2 = scmp.ge.s32.totalorder %s948_s15, 1 }
   0x6   : > { %p116_p3 = scmp.lt.s32.totalorder %s948_s15, 3  ;;  %s127_s21 = sshll.u32 %s1306_s1, 4  ;;  %s128_s21 = int_to_ptr.hbm [resolvable:$true] %s127_s21 }
   0x7   : > { %p1003_p4 = por %p995_p1, %p37_p0  ;;  %s950_s23 = smov [#allocation4]  }
   0x8   : > { %p1010_p5 = pnand %p733_p2, %p116_p3  ;;  %s129_s24 = sshll.u32 %s950_s23, 4  ;;  %s130_s24 = int_to_ptr.vmem [resolvable:$true] %s129_s24 }
   0x9   : > { %s1019_s25 = sadd.s32 1, %s948_s15   ;;  %s951_s26 = smov 128  }
   0xa   : > { %p787_p6 = pneg %p1010_p5  ;;  %s952_s27 = smov 8  }
   0xb   : > { %s21_s28 = ssub.s32 %s948_s15, %s1019_s25  ;;  %s24_s29 = sadd.s32 1, %s944_s14 }
   0xc   : > { %p788_p7 = pnand %p787_p6, %p995_p1  ;;  %p22_p8 = scmp.eq.s32.totalorder %s21_s28, 0 }
   0xd   : > { %p31_p9 = scmp.ne.s32.totalorder %s944_s14, %s940_s13  ;;  %p32_p10 = scmp.eq.s32.totalorder %s948_s15, 0 }
   0xe   : > { %790 = dma.hbm_to_vmem [thread:$0]  (!%p788_p7), %s128_s21, 1024, %s130_s24, [#allocation5], %s951_s26, %s951_s26, %s952_s27  }
   0xf   : > { %p796_p11 = scmp.lt.s32.totalorder %s948_s15, 2  ;;  %p33_p12 = por %p32_p10, %p31_p9 }
  0x10   : > { %s1032_s30 = scalar_select %p22_p8, %s944_s14, %s24_s29  }
  0x11   : > { %s146_s4 = sand.u32 1, %s944_s14   ;;  %s772_s6 = sshll.u32 %s948_s15, 7 }
  0x12   : > { %s736_s5 = sshll.u32 %s146_s4, 7  ;;  %s156_s9 = scalar_lea.hbm %s1305_s0, %s772_s6 }
  0x13   : > { %s150_s10 = scalar_lea.vmem [#allocation2], %s736_s5  ;;  %s157_s12 = sshll.u32 %s156_s9, 4  ;;  %s158_s12 = int_to_ptr.hbm [resolvable:$true] %s157_s12 }
  0x14   : > { %s159_s11 = sshll.u32 %s150_s10, 4  ;;  %p1039_p13 = pnand %p796_p11, %p33_p12  ;;  %s160_s11 = int_to_ptr.vmem [resolvable:$true] %s159_s11 }
  0x15   : > { %s147_s20 = scalar_lea.sflag [#allocation3], %s146_s4  ;;  %s880_s21 = sshra.s32 %s158_s12, 4  ;;  %s881_s21 = int_to_ptr.hbm [resolvable:$true] %s880_s21 }
  0x16   : > { %s882_s23 = scalar_lea.hbm %s881_s21, 128  ;;  %p884_p2 = pneg %p1039_p13 }
  0x17   : > { %p883_p0 = scmp.ne.s32.totalorder %s881_s21, %s882_s23  ;;  %s887_s29 = scalar_lea.hbm %s1305_s0, 256 }
  0x18   : > { %p888_p7 = scmp.lt.s32.totalorder %s881_s21, %s1305_s0  ;;  %p889_p8 = scmp.lt.s32.totalorder %s887_s29, %s882_s23 }
  0x19   : > { %p885_p3 = pnand %p884_p2, %p883_p0 }
  0x1a   : > { %p890_p9 = por %p889_p8, %p888_p7 }
  0x1b   : > { %p886_p6 = pneg %p885_p3 }
  0x1d   : > { %p891_p10 = pnand %p890_p9, %p886_p6 }
  0x1f   : > { %894 = shalt.err (!%p891_p10)
}
  0x20   : > { %794 = dma.hbm_to_vmem [thread:$0]  (!%p1039_p13), %s158_s12, 2048, %s160_s11, %s147_s20, %s951_s26, %s951_s26, %s952_s27  }
  0x21   : > { %171 = sbr.rel (%p1010_p5) target bundleno = 489 (0x1e9), region = 32  ;;  %s173_s4 = sand.u32 (!%p1010_p5), 1, %s940_s13  }
  0x22   : > { %s741_s7 = sshll.u32 (!%p1010_p5), %s173_s4, 7  ;;  %s174_s8 = scalar_lea.sflag (!%p1010_p5), [#allocation3], %s173_s4 }
  0x23   : > { %s1059_s9 = scalar_lea.vmem (!%p1010_p5), [#allocation2], %s741_s7 }
  0x26   : > { %927 = dma.done.wait (%p1003_p4), %s174_s8, 2048  }
  0x27   : > { %929 = vsyncadd (%p1003_p4), %s174_s8, 4294965248 }
  0x28   : > { %931 = dma.done.wait (%p995_p1), [#allocation5], 1024  }
  0x29   : > { %933 = vsyncadd (%p995_p1), [#allocation5], 4294966272  ;;  %vm230_vm0 = vcmask 261120   ;;  %v217_v0 = vld [vmem:[%s1059_s9 + $0x40] sm:$0xff]  ;;  %v1072_v2 = vld [vmem:[%s1059_s9 + $0x50] sm:$0xff]  ;;  %s743_s17 = sshll.u32 %s731_s16, 3 }
  0x2a   : > { %v213_v1 = vld [vmem:[%s1059_s9] sm:$0xff]  ;;  %v243_v3 = vsel %vm230_vm0, %v217_v0, 0.0  ;;  %v246_v5 = vsel %vm230_vm0, %v1072_v2, 0.0  ;;  %v749_v6 = vld [vmem:[%s1059_s9 + $0x48] sm:$0xff]  ;;  %v1081_v8 = vld [vmem:[%s1059_s9 + $0x58] sm:$0xff]  ;;  %p208_p1 = scmp.lt.s32.totalorder %s743_s17, 15 }
  0x2b   : > { %v231_v4 = vsel %vm230_vm0, %v213_v1, 0.0  ;;  %244 = vadd.xlane.f32.xlu0 %v243_v3  ;;  %247 = vadd.xlane.f32.xlu2 %v246_v5  ;;  %v745_v7 = vld [vmem:[%s1059_s9 + $0x8] sm:$0xff]  ;;  %v267_v9 = vsel %vm230_vm0, %v749_v6, 0.0  ;;  %v270_v11 = vsel %vm230_vm0, %v1081_v8, 0.0  ;;  %v1088_v12 = vld [vmem:[%s1059_s9 + $0x10] sm:$0xff]  ;;  %v1091_v13 = vld [vmem:[%s1059_s9 + $0x18] sm:$0xff] }
  0x2c   : > { %232 = vadd.xlane.f32.xlu1 %v231_v4  ;;  %v255_v10 = vsel %vm230_vm0, %v745_v7, 0.0  ;;  %v1094_v14 = vld [vmem:[%s1059_s9 + $0x60] sm:$0xff]  ;;  %v234_v15 = vsel %vm230_vm0, %v1088_v12, 0.0  ;;  %v258_v16 = vsel %vm230_vm0, %v1091_v13, 0.0  ;;  %v1103_v18 = vld [vmem:[%s1059_s9 + $0x68] sm:$0xff]  ;;  %v1118_v24 = vld [vmem:[%s1059_s9 + $0x70] sm:$0xff] }
  0x2d   : > { %v249_v17 = vsel %vm230_vm0, %v1094_v14, 0.0  ;;  %v1106_v19 = vld [vmem:[%s1059_s9 + $0x20] sm:$0xff]  ;;  %v1109_v20 = vld [vmem:[%s1059_s9 + $0x28] sm:$0xff]  ;;  %v273_v21 = vsel %vm230_vm0, %v1103_v18, 0.0  ;;  %v1121_v25 = vld [vmem:[%s1059_s9 + $0x78] sm:$0xff]  ;;  %v252_v27 = vsel %vm230_vm0, %v1118_v24, 0.0 }
  0x2e   : > { %v237_v22 = vsel %vm230_vm0, %v1106_v19, 0.0  ;;  %v261_v23 = vsel %vm230_vm0, %v1109_v20, 0.0  ;;  %v1124_v26 = vld [vmem:[%s1059_s9 + $0x30] sm:$0xff]  ;;  %v276_v28 = vsel %vm230_vm0, %v1121_v25, 0.0  ;;  %v1133_v30 = vld [vmem:[%s1059_s9 + $0x38] sm:$0xff]  ;;  %s1318_s17 = smov (!%p208_p1, %s743_s17), 15 }
  0x2f   : > { %v240_v29 = vsel %vm230_vm0, %v1124_v26, 0.0  ;;  %v264_v31 = vsel %vm230_vm0, %v1133_v30, 0.0  ;;  %s744_s18 = sshll.u32 %s1318_s17, 3 }
  0x30   : > { %s1274_s11 = scalar_lea.vmem %s1308_s3, %s744_s18 }
  0x33   : > { %268 = vadd.xlane.f32.xlu0 %v267_v9  ;;  %271 = vadd.xlane.f32.xlu2 %v270_v11 }
  0x34   : > { %256 = vadd.xlane.f32.xlu1 %v255_v10 }
  0x3b   : > { %235 = vadd.xlane.f32.xlu0 %v234_v15  ;;  %250 = vadd.xlane.f32.xlu2 %v249_v17 }
  0x3c   : > { %259 = vadd.xlane.f32.xlu1 %v258_v16 }
  0x43   : > { %274 = vadd.xlane.f32.xlu0 %v273_v21  ;;  %262 = vadd.xlane.f32.xlu2 %v261_v23 }
  0x44   : > { %238 = vadd.xlane.f32.xlu1 %v237_v22 }
  0x4b   : > { %253 = vadd.xlane.f32.xlu0 %v252_v27  ;;  %241 = vadd.xlane.f32.xlu2 %v240_v29 }
  0x4c   : > { %277 = vadd.xlane.f32.xlu1 %v276_v28 }
  0x53   : > { %265 = vadd.xlane.f32.xlu0 %v264_v31 }
  0x9e   : > { %v245_v32 = vpop.xlane.xlu0 %244  ;;  %v248_v34 = vpop.xlane.xlu2 %247 }
  0x9f   : > { %v233_v33 = vpop.xlane.xlu1 %232 }
  0xa6   : > { %v269_v35 = vpop.xlane.xlu0 %268  ;;  %v272_v39 = vpop.xlane.xlu2 %271 }
  0xa7   : > { %v257_v36 = vpop.xlane.xlu1 %256  ;;  %v283_v37 = vadd.f32 %v269_v35, %v245_v32  ;;  %v284_v40 = vadd.f32 %v272_v39, %v248_v34 }
  0xa8   : > { %v279_v38 = vadd.f32 %v257_v36, %v233_v33 }
  0xa9   : > { %v291_v41 = vmul.f32 0.015625, %v283_v37  ;;  %v292_v43 = vmul.f32 0.015625, %v284_v40 }
  0xaa   : > { %v287_v42 = vmul.f32 0.015625, %v279_v38 }
  0xab   : > { %v1137_v44 = vsub.f32 %v217_v0, %v291_v41  ;;  %v1139_v45 = vsub.f32 %v749_v6, %v291_v41  ;;  %v1152_v51 = vsub.f32 %v1072_v2, %v292_v43  ;;  %v1158_v59 = vsub.f32 %v1081_v8, %v292_v43 }
  0xac   : > { %v1141_v46 = vsub.f32 %v213_v1, %v287_v42  ;;  %v1149_v50 = vsub.f32 %v745_v7, %v287_v42 }
  0xad   : > { %v347_v47 = vmul.f32 %v1139_v45, %v1139_v45  ;;  %v315_v48 = vmul.f32 %v1137_v44, %v1137_v44  ;;  %v316_v61 = vmul.f32 %v1152_v51, %v1152_v51  ;;  %v348_v63 = vmul.f32 %v1158_v59, %v1158_v59 }
  0xae   : > { %v311_v49 = vmul.f32 %v1141_v46, %v1141_v46  ;;  %v236_v52 = vpop.xlane.xlu0 %235  ;;  %v251_v57 = vpop.xlane.xlu2 %250  ;;  %v343_v62 = vmul.f32 %v1149_v50, %v1149_v50 }
  0xaf   : > { %v260_v53 = vpop.xlane.xlu1 %259  ;;  %v363_v54 = vsel %vm230_vm0, %v347_v47, 0.0  ;;  %v331_v55 = vsel %vm230_vm0, %v315_v48, 0.0  ;;  %v334_v5 = vsel %vm230_vm0, %v316_v61, 0.0  ;;  %v366_v8 = vsel %vm230_vm0, %v348_v63, 0.0  ;;  %v495_v61 = vld [vmem:[#allocation4] sm:$0xff] }
  0xb0   : > { %v319_v56 = vsel %vm230_vm0, %v311_v49, 0.0  ;;  %v280_v58 = vadd.f32 %v260_v53, %v236_v52  ;;  %364 = vadd.xlane.f32.xlu2 %v363_v54  ;;  %332 = vadd.xlane.f32.xlu1 %v331_v55  ;;  %v351_v6 = vsel %vm230_vm0, %v343_v62, 0.0  ;;  %v498_v54 = vld [vmem:[#allocation4 + $0x18] sm:$0xff]  ;;  %v502_v55 = vld [vmem:[#allocation4 + $0x30] sm:$0xff] }
  0xb1   : > { %320 = vadd.xlane.f32.xlu0 %v319_v56  ;;  %777 = vmatpush.msra.mxu3 %v498_v54  ;;  %v497_v56 = vld [vmem:[#allocation4 + $0x10] sm:$0xff] }
  0xb2   : > { %v288_v60 = vmul.f32 0.015625, %v280_v58  ;;  %605 = vmatpush.msra.mxu1 %v498_v54  ;;  %v496_v58 = vld [vmem:[#allocation4 + $0x8] sm:$0xff] }
  0xb3   : > { %778 = vmatpush.msra.mxu3 %v497_v56 }
  0xb4   : > { %v1167_v0 = vsub.f32 %v1088_v12, %v288_v60  ;;  %v1170_v1 = vsub.f32 %v1091_v13, %v288_v60  ;;  %606 = vmatpush.msra.mxu1 %v497_v56  ;;  %v500_v60 = vld [vmem:[#allocation4 + $0x20] sm:$0xff] }
  0xb5   : > { %779 = vmatpush.msra.mxu3 %v496_v58 }
  0xb6   : > { %v275_v2 = vpop.xlane.xlu0 %274  ;;  %v263_v7 = vpop.xlane.xlu2 %262  ;;  %v344_v11 = vmul.f32 %v1170_v1, %v1170_v1  ;;  %v312_v12 = vmul.f32 %v1167_v0, %v1167_v0  ;;  %607 = vmatpush.msra.mxu1 %v496_v58 }
  0xb7   : > { %v239_v3 = vpop.xlane.xlu1 %238  ;;  %v285_v4 = vadd.f32 %v275_v2, %v251_v57  ;;  %v501_v57 = vld [vmem:[#allocation4 + $0x28] sm:$0xff]  ;;  %780 = vmatpush.msra.mxu3 %v495_v61 }
  0xb8   : > { %335 = vadd.xlane.f32.xlu2 %v334_v5  ;;  %352 = vadd.xlane.f32.xlu1 %v351_v6  ;;  %v281_v9 = vadd.f32 %v263_v7, %v239_v3  ;;  %v354_v21 = vsel %vm230_vm0, %v344_v11, 0.0  ;;  %v322_v22 = vsel %vm230_vm0, %v312_v12, 0.0 }
  0xb9   : > { %v293_v10 = vmul.f32 0.015625, %v285_v4  ;;  %367 = vadd.xlane.f32.xlu0 %v366_v8  ;;  %608 = vmatpush.msra.mxu1 %v495_v61 }
  0xba   : > { %v289_v13 = vmul.f32 0.015625, %v281_v9 }
  0xbb   : > { %v1180_v15 = vsub.f32 %v1094_v14, %v293_v10  ;;  %v1193_v29 = vsub.f32 %v1103_v18, %v293_v10 }
  0xbc   : > { %v1183_v16 = vsub.f32 %v1106_v19, %v289_v13  ;;  %v1190_v23 = vsub.f32 %v1109_v20, %v289_v13 }
  0xbd   : > { %v317_v17 = vmul.f32 %v1180_v15, %v1180_v15  ;;  %v349_v20 = vmul.f32 %v1193_v29, %v1193_v29 }
  0xbe   : > { %v254_v27 = vpop.xlane.xlu0 %253  ;;  %v313_v32 = vmul.f32 %v1183_v16, %v1183_v16  ;;  %v345_v33 = vmul.f32 %v1190_v23, %v1190_v23  ;;  %v242_v34 = vpop.xlane.xlu2 %241 }
  0xbf   : > { %v278_v28 = vpop.xlane.xlu1 %277  ;;  %v337_v14 = vsel %vm230_vm0, %v317_v17, 0.0  ;;  %v369_v39 = vsel %vm230_vm0, %v349_v20, 0.0 }
  0xc0   : > { %v286_v31 = vadd.f32 %v278_v28, %v254_v27  ;;  %355 = vadd.xlane.f32.xlu2 %v354_v21  ;;  %323 = vadd.xlane.f32.xlu1 %v322_v22  ;;  %v325_v36 = vsel %vm230_vm0, %v313_v32, 0.0  ;;  %v357_v37 = vsel %vm230_vm0, %v345_v33, 0.0 }
  0xc1   : > { %338 = vadd.xlane.f32.xlu0 %v337_v14 }
  0xc2   : > { %v294_v19 = vmul.f32 0.015625, %v286_v31 }
  0xc4   : > { %v1203_v18 = vsub.f32 %v1118_v24, %v294_v19  ;;  %v1206_v35 = vsub.f32 %v1121_v25, %v294_v19 }
  0xc6   : > { %v266_v38 = vpop.xlane.xlu0 %265  ;;  %v350_v42 = vmul.f32 %v1206_v35, %v1206_v35  ;;  %v318_v24 = vmul.f32 %v1203_v18, %v1203_v18 }
  0xc7   : > { %v282_v40 = vadd.f32 %v266_v38, %v242_v34 }
  0xc8   : > { %370 = vadd.xlane.f32.xlu1 %v369_v39  ;;  %326 = vadd.xlane.f32.xlu2 %v325_v36  ;;  %v372_v47 = vsel %vm230_vm0, %v350_v42, 0.0  ;;  %v340_v48 = vsel %vm230_vm0, %v318_v24, 0.0 }
  0xc9   : > { %358 = vadd.xlane.f32.xlu0 %v357_v37  ;;  %v290_v41 = vmul.f32 0.015625, %v282_v40 }
  0xcb   : > { %v1216_v25 = vsub.f32 %v1124_v26, %v290_v41  ;;  %v1219_v43 = vsub.f32 %v1133_v30, %v290_v41  ;;  %v503_v30 = vld [vmem:[#allocation4 + $0x38] sm:$0xff] }
  0xcc   : > { %773 = vmatpush.msra.mxu2 %v503_v30  ;;  %540 = vmatpush.msra.mxu0 %v503_v30 }
  0xcd   : > { %v314_v49 = vmul.f32 %v1216_v25, %v1216_v25  ;;  %v346_v53 = vmul.f32 %v1219_v43, %v1219_v43 }
  0xce   : > { %774 = vmatpush.msra.mxu2 %v502_v55  ;;  %541 = vmatpush.msra.mxu0 %v502_v55 }
  0xcf   : > { %v328_v52 = vsel %vm230_vm0, %v314_v49, 0.0  ;;  %v360_v26 = vsel %vm230_vm0, %v346_v53, 0.0 }
  0xd0   : > { %373 = vadd.xlane.f32.xlu2 %v372_v47  ;;  %341 = vadd.xlane.f32.xlu1 %v340_v48 }
  0xd1   : > { %329 = vadd.xlane.f32.xlu0 %v328_v52  ;;  %775 = vmatpush.msra.mxu2 %v501_v57 }
  0xd2   : > { %542 = vmatpush.msra.mxu0 %v501_v57 }
  0xd3   : > { %776 = vmatpush.msra.mxu2 %v500_v60 }
  0xd4   : > { %543 = vmatpush.msra.mxu0 %v500_v60 }
  0xd8   : > { %361 = vadd.xlane.f32.xlu1 %v360_v26 }
 0x123   : > { %v365_v62 = vpop.xlane.xlu2 %364  ;;  %v333_v63 = vpop.xlane.xlu1 %332 }
 0x124   : > { %v321_v2 = vpop.xlane.xlu0 %320  ;;  %v379_v3 = vadd.f32 %v365_v62, %v333_v63 }
 0x126   : > { %v387_v4 = vmul.f32 0.015625, %v379_v3 }
 0x128   : > { %v395_v5 = vadd.f32 1e-05, %v387_v4 }
 0x12a   : > { %834 = vrsqrt.f32 %v395_v5  ;;  %vm445_vm2 = vweird.f32 %v395_v5 }
 0x12b   : > { %v336_v6 = vpop.xlane.xlu2 %335  ;;  %v353_v7 = vpop.xlane.xlu1 %352 }
 0x12c   : > { %v368_v8 = vpop.xlane.xlu0 %367  ;;  %v375_v9 = vadd.f32 %v353_v7, %v321_v2 }
 0x12d   : > { %v380_v10 = vadd.f32 %v368_v8, %v336_v6 }
 0x12e   : > { %v383_v11 = vmul.f32 0.015625, %v375_v9 }
 0x12f   : > { %v388_v12 = vmul.f32 0.015625, %v380_v10 }
 0x130   : > { %v835_v13 = vpop.eup %834  ;;  %v391_v17 = vadd.f32 1e-05, %v383_v11 }
 0x131   : > { %v440_v21 = vmul.f32 %v835_v13, %v395_v5  ;;  %v396_v22 = vadd.f32 1e-05, %v388_v12  ;;  %vm446_vm1 = vweird.f32 %v835_v13 }
 0x132   : > { %836 = vrsqrt.f32 %v391_v17  ;;  %vm447_vm3 = vmor %vm445_vm2, %vm446_vm1  ;;  %vm405_vm6 = vweird.f32 %v391_v17 }
 0x133   : > { %v441_v27 = vmul.f32 %v835_v13, %v440_v21  ;;  %838 = vrsqrt.f32 %v396_v22  ;;  %v356_v28 = vpop.xlane.xlu2 %355  ;;  %v324_v14 = vpop.xlane.xlu1 %323  ;;  %vm455_vm7 = vweird.f32 %v396_v22 }
 0x134   : > { %v339_v31 = vpop.xlane.xlu0 %338  ;;  %v376_v19 = vadd.f32 %v356_v28, %v324_v14 }
 0x135   : > { %v442_v32 = vmul.f32 0.5, %v441_v27 }
 0x136   : > { %v384_v33 = vmul.f32 0.015625, %v376_v19 }
 0x137   : > { %v443_v20 = vsub.f32 1.5, %v442_v32 }
 0x138   : > { %v837_v34 = vpop.eup %836  ;;  %v1229_v36 = vadd.f32 1e-05, %v384_v33 }
 0x139   : > { %v839_v37 = vpop.eup %838  ;;  %v400_v38 = vmul.f32 %v837_v34, %v391_v17  ;;  %v444_v39 = vmul.f32 %v835_v13, %v443_v20  ;;  %vm406_vm4 = vweird.f32 %v837_v34 }
 0x13a   : > { %v450_v40 = vmul.f32 %v839_v37, %v396_v22  ;;  %840 = vrsqrt.f32 %v1229_v36  ;;  %vm456_vm5 = vweird.f32 %v839_v37  ;;  %vm407_vm8 = vmor %vm405_vm6, %vm406_vm4  ;;  %vm415_vm11 = vweird.f32 %v1229_v36 }
 0x13b   : > { %v401_v41 = vmul.f32 %v837_v34, %v400_v38  ;;  %v327_v42 = vpop.xlane.xlu2 %326  ;;  %v371_v24 = vpop.xlane.xlu1 %370  ;;  %v448_v47 = vsel %vm447_vm3, %v835_v13, %v444_v39  ;;  %vm457_vm9 = vmor %vm455_vm7, %vm456_vm5 }
 0x13c   : > { %v451_v48 = vmul.f32 %v839_v37, %v450_v40  ;;  %v359_v49 = vpop.xlane.xlu0 %358  ;;  %v381_v52 = vadd.f32 %v371_v24, %v339_v31  ;;  %v491_v53 = vmul.f32 %v448_v47, %v1139_v45  ;;  %v483_v26 = vmul.f32 %v448_v47, %v1137_v44 }
 0x13d   : > { %v402_v30 = vmul.f32 0.5, %v401_v41  ;;  %v377_v54 = vadd.f32 %v359_v49, %v327_v42 }
 0x13e   : > { %v452_v55 = vmul.f32 0.5, %v451_v48  ;;  %v389_v56 = vmul.f32 0.015625, %v381_v52  ;;  %757 = vmatmul.msk.f32.vlgmr.msra.gmra.mxu2 %vm230_vm0, %v491_v53  ;;  %765 = vmatmul.msk.f32.vlgmr.msra.gmra.mxu3 %vm230_vm0, %v483_v26 }
 0x13f   : > { %v403_v57 = vsub.f32 1.5, %v402_v30  ;;  %v385_v58 = vmul.f32 0.015625, %v377_v54 }
 0x140   : > { %v841_v60 = vpop.eup %840  ;;  %v453_v61 = vsub.f32 1.5, %v452_v55  ;;  %v397_v62 = vadd.f32 1e-05, %v389_v56 }
 0x141   : > { %v410_v45 = vmul.f32 %v841_v60, %v1229_v36  ;;  %v393_v63 = vadd.f32 1e-05, %v385_v58  ;;  %v404_v44 = vmul.f32 %v837_v34, %v403_v57  ;;  %vm416_vm10 = vweird.f32 %v841_v60 }
 0x142   : > { %842 = vrsqrt.f32 %v397_v62  ;;  %v454_v2 = vmul.f32 %v839_v37, %v453_v61  ;;  %vm417_vm12 = vmor %vm415_vm11, %vm416_vm10  ;;  %vm465_vm15 = vweird.f32 %v397_v62 }
 0x143   : > { %v411_v3 = vmul.f32 %v841_v60, %v410_v45  ;;  %844 = vrsqrt.f32 %v393_v63  ;;  %v374_v4 = vpop.xlane.xlu2 %373  ;;  %v342_v5 = vpop.xlane.xlu1 %341  ;;  %v408_v6 = vsel %vm407_vm8, %v837_v34, %v404_v44  ;;  %vm425_vm1 = vweird.f32 %v393_v63 }
 0x144   : > { %v382_v7 = vadd.f32 %v374_v4, %v342_v5  ;;  %v487_v8 = vmul.f32 %v408_v6, %v1149_v50  ;;  %v458_v9 = vsel %vm457_vm9, %v839_v37, %v454_v2  ;;  %v479_v10 = vmul.f32 %v408_v6, %v1141_v46 }
 0x145   : > { %v412_v11 = vmul.f32 0.5, %v411_v3  ;;  %v492_v12 = vmul.f32 %v458_v9, %v1158_v59  ;;  %v484_v13 = vmul.f32 %v458_v9, %v1152_v51  ;;  %v330_v59 = vpop.xlane.xlu0 %329 }
 0x146   : > { %v390_v17 = vmul.f32 0.015625, %v382_v7  ;;  %753 = vmatmul.msk.f32.vlgmr.msra.gmra.mxu0 %vm230_vm0, %v487_v8  ;;  %761 = vmatmul.msk.f32.vlgmr.msra.gmra.mxu1 %vm230_vm0, %v479_v10 }
 0x147   : > { %v413_v21 = vsub.f32 1.5, %v412_v11  ;;  %758 = vmatmul.msk.f32.gmra.mxu2 %vm230_vm0, %v492_v12  ;;  %766 = vmatmul.msk.f32.gmra.mxu3 %vm230_vm0, %v484_v13 }
 0x148   : > { %v843_v50 = vpop.eup %842  ;;  %v398_v22 = vadd.f32 1e-05, %v390_v17 }
 0x149   : > { %v845_v27 = vpop.eup %844  ;;  %v460_v46 = vmul.f32 %v843_v50, %v397_v62  ;;  %v414_v28 = vmul.f32 %v841_v60, %v413_v21  ;;  %vm466_vm13 = vweird.f32 %v843_v50 }
 0x14a   : > { %v420_v51 = vmul.f32 %v845_v27, %v393_v63  ;;  %846 = vrsqrt.f32 %v398_v22  ;;  %vm426_vm14 = vweird.f32 %v845_v27  ;;  %vm467_vm2 = vmor %vm465_vm15, %vm466_vm13  ;;  %vm475_vm5 = vweird.f32 %v398_v22 }
 0x14b   : > { %v461_v14 = vmul.f32 %v843_v50, %v460_v46  ;;  %v362_v31 = vpop.xlane.xlu1 %361  ;;  %v418_v19 = vsel %vm417_vm12, %v841_v60, %v414_v28  ;;  %vm427_vm3 = vmor %vm425_vm1, %vm426_vm14 }
 0x14c   : > { %v421_v32 = vmul.f32 %v845_v27, %v420_v51  ;;  %v378_v33 = vadd.f32 %v362_v31, %v330_v59  ;;  %v488_v20 = vmul.f32 %v418_v19, %v1170_v1  ;;  %v480_v34 = vmul.f32 %v418_v19, %v1167_v0 }
 0x14d   : > { %v462_v37 = vmul.f32 0.5, %v461_v14 }
 0x14e   : > { %v422_v38 = vmul.f32 0.5, %v421_v32  ;;  %v386_v39 = vmul.f32 0.015625, %v378_v33  ;;  %754 = vmatmul.msk.f32.gmra.mxu0 %vm230_vm0, %v488_v20  ;;  %762 = vmatmul.msk.f32.gmra.mxu1 %vm230_vm0, %v480_v34 }
 0x14f   : > { %v463_v36 = vsub.f32 1.5, %v462_v37 }
 0x150   : > { %v847_v40 = vpop.eup %846  ;;  %v423_v41 = vsub.f32 1.5, %v422_v38  ;;  %v394_v42 = vadd.f32 1e-05, %v386_v39 }
 0x151   : > { %v470_v24 = vmul.f32 %v847_v40, %v398_v22  ;;  %v464_v47 = vmul.f32 %v843_v50, %v463_v36  ;;  %vm476_vm4 = vweird.f32 %v847_v40 }
 0x152   : > { %848 = vrsqrt.f32 %v394_v42  ;;  %v424_v0 = vmul.f32 %v845_v27, %v423_v41  ;;  %vm477_vm6 = vmor %vm475_vm5, %vm476_vm4  ;;  %vm435_vm8 = vweird.f32 %v394_v42 }
 0x153   : > { %v471_v1 = vmul.f32 %v847_v40, %v470_v24  ;;  %v468_v48 = vsel %vm467_vm2, %v843_v50, %v464_v47 }
 0x154   : > { %v428_v49 = vsel %vm427_vm3, %v845_v27, %v424_v0  ;;  %v493_v52 = vmul.f32 %v468_v48, %v1193_v29  ;;  %v485_v53 = vmul.f32 %v468_v48, %v1180_v15 }
 0x155   : > { %v472_v26 = vmul.f32 0.5, %v471_v1  ;;  %v489_v30 = vmul.f32 %v428_v49, %v1190_v23  ;;  %v481_v54 = vmul.f32 %v428_v49, %v1183_v16 }
 0x156   : > { %759 = vmatmul.msk.f32.gmra.mxu2 %vm230_vm0, %v493_v52  ;;  %767 = vmatmul.msk.f32.gmra.mxu3 %vm230_vm0, %v485_v53 }
 0x157   : > { %v473_v55 = vsub.f32 1.5, %v472_v26  ;;  %755 = vmatmul.msk.f32.gmra.mxu0 %vm230_vm0, %v489_v30  ;;  %763 = vmatmul.msk.f32.gmra.mxu1 %vm230_vm0, %v481_v54 }
 0x158   : > { %v849_v56 = vpop.eup %848 }
 0x159   : > { %v430_v29 = vmul.f32 %v849_v56, %v394_v42  ;;  %v474_v57 = vmul.f32 %v847_v40, %v473_v55  ;;  %vm436_vm7 = vweird.f32 %v849_v56 }
 0x15a   : > { %vm437_vm9 = vmor %vm435_vm8, %vm436_vm7 }
 0x15b   : > { %v431_v15 = vmul.f32 %v849_v56, %v430_v29  ;;  %v478_v58 = vsel %vm477_vm6, %v847_v40, %v474_v57 }
 0x15c   : > { %v494_v16 = vmul.f32 %v478_v58, %v1206_v35  ;;  %v486_v23 = vmul.f32 %v478_v58, %v1203_v18  ;;  %v833_v18 = vld [vmem:[%s1307_s2] ss:$0 sm:$0xff] }
 0x15d   : > { %v432_v60 = vmul.f32 0.5, %v431_v15 }
 0x15e   : > { %760 = vmatmul.msk.f32.gmra.mxu2 %vm230_vm0, %v494_v16  ;;  %768 = vmatmul.msk.f32.gmra.mxu3 %vm230_vm0, %v486_v23 }
 0x15f   : > { %v433_v61 = vsub.f32 1.5, %v432_v60 }
 0x161   : > { %v434_v62 = vmul.f32 %v849_v56, %v433_v61 }
 0x163   : > { %v438_v45 = vsel %vm437_vm9, %v849_v56, %v434_v62 }
 0x164   : > { %v490_v63 = vmul.f32 %v438_v45, %v1219_v43  ;;  %v482_v44 = vmul.f32 %v438_v45, %v1216_v25 }
 0x166   : > { %756 = vmatmul.msk.f32.gmra.mxu0 %vm230_vm0, %v490_v63  ;;  %764 = vmatmul.msk.f32.gmra.mxu1 %vm230_vm0, %v482_v44 }
 0x1c1   : > { %v557_v35 = vpop.f32.mrf.mxu2  ;;  %v622_v2 = vpop.f32.mrf.mxu3 }
 0x1c2   : > { %v623_v3 = vadd.f32 %v622_v2, %v557_v35 }
 0x1c3   : > { %v545_v25 = vpop.f32.mrf.mxu0  ;;  %v610_v43 = vpop.f32.mrf.mxu1 }
 0x1c4   : > { %v642_v4 = vadd.f32 %v833_v18, %v623_v3  ;;  %v611_v5 = vadd.f32 %v610_v43, %v545_v25 }
 0x1c6   : > { %650 = vst.msk [vmem:[%s1274_s11 + $0x20] sm:$0xff] %vm230_vm0, %v642_v4  ;;  %v638_v6 = vadd.f32 %v833_v18, %v611_v5 }
 0x1c8   : > { %646 = vst.msk [vmem:[%s1274_s11] sm:$0xff] %vm230_vm0, %v638_v6 }
 0x1ca   : > { %v560_v7 = vpop.f32.mrf.mxu2  ;;  %v625_v8 = vpop.f32.mrf.mxu3 }
 0x1cb   : > { %v626_v9 = vadd.f32 %v625_v8, %v560_v7  ;;  %v548_v10 = vpop.f32.mrf.mxu0  ;;  %v613_v11 = vpop.f32.mrf.mxu1 }
 0x1cc   : > { %v614_v12 = vadd.f32 %v613_v11, %v548_v10 }
 0x1cd   : > { %v643_v13 = vadd.f32 %v833_v18, %v626_v9 }
 0x1ce   : > { %v639_v17 = vadd.f32 %v833_v18, %v614_v12 }
 0x1cf   : > { %651 = vst.msk [vmem:[%s1274_s11 + $0x28] sm:$0xff] %vm230_vm0, %v643_v13 }
 0x1d0   : > { %647 = vst.msk [vmem:[%s1274_s11 + $0x8] sm:$0xff] %vm230_vm0, %v639_v17 }
 0x1d4   : > { %v551_v21 = vpop.f32.mrf.mxu0  ;;  %v616_v50 = vpop.f32.mrf.mxu1 }
 0x1d5   : > { %v617_v22 = vadd.f32 %v616_v50, %v551_v21 }
 0x1d7   : > { %v640_v27 = vadd.f32 %v833_v18, %v617_v22 }
 0x1d9   : > { %648 = vst.msk [vmem:[%s1274_s11 + $0x10] sm:$0xff] %vm230_vm0, %v640_v27  ;;  %v563_v46 = vpop.f32.mrf.mxu2  ;;  %v628_v59 = vpop.f32.mrf.mxu3 }
 0x1da   : > { %v629_v28 = vadd.f32 %v628_v59, %v563_v46 }
 0x1dc   : > { %v644_v51 = vadd.f32 %v833_v18, %v629_v28 }
 0x1de   : > { %652 = vst.msk [vmem:[%s1274_s11 + $0x30] sm:$0xff] %vm230_vm0, %v644_v51 }
 0x1e1   : > { %v566_v14 = vpop.f32.mrf.mxu2  ;;  %v631_v31 = vpop.f32.mrf.mxu3 }
 0x1e2   : > { %v632_v19 = vadd.f32 %v631_v31, %v566_v14 }
 0x1e3   : > { %v554_v32 = vpop.f32.mrf.mxu0  ;;  %v619_v33 = vpop.f32.mrf.mxu1 }
 0x1e4   : > { %v645_v20 = vadd.f32 %v833_v18, %v632_v19  ;;  %v620_v34 = vadd.f32 %v619_v33, %v554_v32 }
 0x1e6   : > { %653 = vst.msk [vmem:[%s1274_s11 + $0x38] sm:$0xff] %vm230_vm0, %v645_v20  ;;  %v641_v37 = vadd.f32 %v833_v18, %v620_v34 }
 0x1e8   : > { %649 = vst.msk [vmem:[%s1274_s11 + $0x18] sm:$0xff] %vm230_vm0, %v641_v37 }
 0x1e9 PF: > { %p14_p4 = scmp.ge.s32.totalorder %s1019_s25, 4   ;;  %s1313_s12 = smov %s940_s13 }
 0x1ea   : > { %s1314_s13 = smov %s944_s14  ;;  %s1315_s14 = smov %s1032_s30 }
 0x1eb   : > { %s1316_s15 = smov %s1019_s25  ;;  %16 = sbr.rel (!%p14_p4) target bundleno = 4 (0x4), region = 78 }
 0x1f0   :  { %676 = vsyncpa [#allocation3], 1 }
 0x1f1   :  { %678 = vsyncpa [#allocation3 + $0x1], 1 }
 0x1f2   :  { %679 = vsyncpa [#allocation5], 1 }

</bundles_post_ra>
